<compile_context>
chip_gen: v7x
topology: tpu7x:2x2x1
jax: 0.10.0
libtpu: 0.0.40
codegen_flags: <defaults>
</compile_context>

<pallas_src>
import math

import jax
import jax.numpy as jnp
from jax.experimental import pallas as pl
from jax.experimental.pallas import tpu as pltpu


# ---------------------------------------------------------------------------
# Exact GELU (erf-based, matches torch.nn.functional.gelu default).
# ---------------------------------------------------------------------------
def _erf_approx(z):
    # Abramowitz & Stegun 7.1.26, max abs error ~1.5e-7 (effectively exact f32).
    a1, a2, a3, a4, a5 = (0.254829592, -0.284496736, 1.421413741,
                          -1.453152027, 1.061405429)
    p = 0.3275911
    az = jnp.abs(z)
    d = 1.0 + p * az
    # EUP reciprocal + one Newton refinement (near-exact) keeps the divide off
    # the VALU slots (which saturate first on v6e/v7x when weights are bf16).
    t = pl.reciprocal(d, approx=True)
    t = t * (2.0 - d * t)
    poly = ((((a5 * t + a4) * t + a3) * t + a2) * t + a1) * t
    y = 1.0 - poly * jnp.exp(-az * az)
    return jnp.where(z >= 0, y, -y)


def _gelu_exact(x):
    # 0.5 * x * (1 + erf(x / sqrt(2)))
    return 0.5 * x * (1.0 + _erf_approx(x * (1.0 / math.sqrt(2.0))))


# ---------------------------------------------------------------------------
# Kernel bodies.
# ---------------------------------------------------------------------------
def _ffn_resident_kernel(x_ref, w1_ref, b1_ref, w2_ref, b2_ref, o_ref):
    # Weights are fully resident in VMEM (constant index_map -> loaded once).
    h = jnp.dot(x_ref[...], w1_ref[...], preferred_element_type=jnp.float32)
    h = _gelu_exact(h + b1_ref[...].astype(jnp.float32))
    y = jnp.dot(h.astype(w2_ref.dtype), w2_ref[...],
                preferred_element_type=jnp.float32)
    o_ref[...] = (y + b2_ref[...].astype(jnp.float32)).astype(o_ref.dtype)


def _ffn_tiled_kernel(x_ref, w1_ref, b1_ref, w2_ref, b2_ref, o_ref, acc_ref):
    # Fallback path: ff_dim streamed in slices (reduction axis of the second
    # matmul), partials accumulated in a resident f32 scratch.
    j = pl.program_id(1)

    @pl.when(j == 0)
    def _():
        acc_ref[...] = jnp.zeros_like(acc_ref)

    h = jnp.dot(x_ref[...], w1_ref[...], preferred_element_type=jnp.float32)
    h = _gelu_exact(h + b1_ref[...].astype(jnp.float32))
    acc_ref[...] += jnp.dot(h.astype(w2_ref.dtype), w2_ref[...],
                            preferred_element_type=jnp.float32)

    @pl.when(j == pl.num_programs(1) - 1)
    def _():
        o_ref[...] = (acc_ref[...] + b2_ref[...].astype(jnp.float32)
                      ).astype(o_ref.dtype)


# ---------------------------------------------------------------------------
# Host-side helpers.
# ---------------------------------------------------------------------------
def _round_up(n, m):
    return ((n + m - 1) // m) * m


def _vmem_capacity_bytes():
    try:
        info = pltpu.get_tpu_info()
        cap = getattr(info, "vmem_capacity_bytes", None)
        if cap:
            return int(cap)
    except Exception:
        pass
    return 64 * 1024 * 1024  # conservative (v7x per-core figure)


def _pick_ff_tile(ff, block_f):
    """Largest lane-aligned (multiple-of-128) divisor of ff <= block_f.

    Using a divisor avoids a ragged tile on the reduction axis (padded garbage
    there would flow through GELU and pollute valid output rows).
    """
    if ff <= block_f:
        return ff
    d = (block_f // 128) * 128
    while d >= 128:
        if ff % d == 0:
            return d
        d -= 128
    # TODO(synk): ff_dim with no 128-aligned divisor <= block_f falls back to a
    # full-extent slice (may need a larger vmem_limit); not hit for ViT dims.
    return ff


# ---------------------------------------------------------------------------
# Public wrapper: fc2(gelu(fc1(x)))
#   x:  (..., D)
#   w1: (D, FF), b1: (FF,)   (fc1 weight stored pre-transposed vs torch)
#   w2: (FF, D), b2: (D,)
# ---------------------------------------------------------------------------
def position_wise_feed_forward(x, w1, b1, w2, b2, *, block_m=512, block_f=512):
    orig_shape = x.shape
    D = orig_shape[-1]
    FF = w1.shape[1]
    assert w1.shape == (D, FF) and b1.shape == (FF,)
    assert w2.shape == (FF, D) and b2.shape == (D,)

    M = 1
    for s in orig_shape[:-1]:
        M *= s
    x2 = x.reshape(M, D)
    b1_2 = b1.reshape(1, FF)
    b2_2 = b2.reshape(1, D)

    out_dtype = x.dtype
    xb = jnp.dtype(x.dtype).itemsize
    wb = jnp.dtype(w1.dtype).itemsize
    ob = jnp.dtype(out_dtype).itemsize

    # Token tile.  32-aligned so the sublane tiling is valid for f32 and bf16;
    # no HBM padding of x -- the single ragged edge block is masked by Pallas
    # and its rows are independent of the valid ones.
    tm = min(block_m, _round_up(M, 32))
    m_tiles = (M + tm - 1) // tm

    vmem_cap = _vmem_capacity_bytes()
    headroom = 8 << 20

    # Conservative footprint for keeping both weights resident (assumes worst
    # case double-buffered copies + f32 intermediates).
    resident_bytes = (
        2 * tm * D * xb                # x tile (double-buffered)
        + 2 * tm * D * ob              # out tile (double-buffered)
        + 2 * (D * FF + FF) * wb       # W1 + b1
        + 2 * (FF * D + D) * wb        # W2 + b2
        + tm * FF * 4                  # f32 GELU intermediate
        + tm * D * 4                   # f32 fc2 result
    )
    resident_budget = max(40 << 20, int(vmem_cap * 0.6))

    if resident_bytes <= resident_budget:
        # ---- 1-D grid, weights resident in VMEM (loaded from HBM once) ----
        vmem_limit = int(min(vmem_cap - headroom,
                             max(32 << 20, resident_bytes + headroom)))
        out = pl.pallas_call(
            _ffn_resident_kernel,
            out_shape=jax.ShapeDtypeStruct((M, D), out_dtype),
            grid_spec=pltpu.PrefetchScalarGridSpec(
                num_scalar_prefetch=0,
                grid=(m_tiles,),
                in_specs=[
                    pl.BlockSpec((tm, D), lambda i: (i, 0)),   # x tokens
                    pl.BlockSpec((D, FF), lambda i: (0, 0)),   # W1 (resident)
                    pl.BlockSpec((1, FF), lambda i: (0, 0)),   # b1 (resident)
                    pl.BlockSpec((FF, D), lambda i: (0, 0)),   # W2 (resident)
                    pl.BlockSpec((1, D), lambda i: (0, 0)),    # b2 (resident)
                ],
                out_specs=pl.BlockSpec((tm, D), lambda i: (i, 0)),
            ),
            compiler_params=pltpu.CompilerParams(
                dimension_semantics=("parallel",),
                vmem_limit_bytes=vmem_limit,
            ),
        )(x2, w1, b1_2, w2, b2_2)
    else:
        # ---- 2-D fallback grid: stream ff_dim slices, accumulate fc2 ----
        tf = _pick_ff_tile(FF, block_f)
        tile_bytes = (
            2 * tm * D * xb + 2 * tm * D * ob
            + 2 * (D * tf + tf) * wb + 2 * (tf * D + D) * wb
            + tm * tf * 4 + tm * D * 4
        )
        vmem_limit = int(min(vmem_cap - headroom,
                             max(32 << 20, tile_bytes + headroom)))
        out = pl.pallas_call(
            _ffn_tiled_kernel,
            out_shape=jax.ShapeDtypeStruct((M, D), out_dtype),
            grid_spec=pltpu.PrefetchScalarGridSpec(
                num_scalar_prefetch=0,
                grid=(m_tiles, FF // tf),
                in_specs=[
                    pl.BlockSpec((tm, D), lambda i, j: (i, 0)),   # x tokens
                    pl.BlockSpec((D, tf), lambda i, j: (0, j)),   # W1 slice
                    pl.BlockSpec((1, tf), lambda i, j: (0, j)),   # b1 slice
                    pl.BlockSpec((tf, D), lambda i, j: (j, 0)),   # W2 slice
                    pl.BlockSpec((1, D), lambda i, j: (0, 0)),    # b2
                ],
                out_specs=pl.BlockSpec((tm, D), lambda i, j: (i, 0)),
                scratch_shapes=[pltpu.VMEM((tm, D), jnp.float32)],
            ),
            compiler_params=pltpu.CompilerParams(
                dimension_semantics=("parallel", "arbitrary"),
                vmem_limit_bytes=vmem_limit,
            ),
        )(x2, w1, b1_2, w2, b2_2)

    return out.reshape(orig_shape)


# ---------------------------------------------------------------------------
# Demo / self-test.
# ---------------------------------------------------------------------------
if __name__ == "__main__":
    # Small shapes consistent with the module: batch=2, seq=8, dim=32, ff_dim=128.
    B, S, dim, ff_dim = 2, 8, 32, 128

    key = jax.random.PRNGKey(0)
    kx, k1, kb1, k2, kb2 = jax.random.split(key, 5)

    x = jax.random.normal(kx, (B, S, dim), dtype=jnp.float32)
    # Torch's nn.Linear stores weight as (out, in); we keep the fc weights
    # pre-transposed so the kernel computes x @ w + b directly.
    w1 = jax.random.normal(k1, (dim, ff_dim), dtype=jnp.float32) / math.sqrt(dim)
    b1 = jax.random.normal(kb1, (ff_dim,), dtype=jnp.float32) * 0.02
    w2 = jax.random.normal(k2, (ff_dim, dim), dtype=jnp.float32) / math.sqrt(ff_dim)
    b2 = jax.random.normal(kb2, (dim,), dtype=jnp.float32) * 0.02

    out = position_wise_feed_forward(x, w1, b1, w2, b2)
    out = jax.block_until_ready(out)

    # Pure-JAX reference with exact (erf) GELU, same as torch F.gelu default.
    ref = jax.nn.gelu(x @ w1 + b1, approximate=False) @ w2 + b2

    assert out.shape == (B, S, dim)
    err = float(jnp.max(jnp.abs(out - ref)))
    assert jnp.allclose(out, ref, atol=1e-4, rtol=1e-4), f"mismatch vs reference: {err}"
    print("KERNEL_OK")
</pallas_src>

<mosaic_0001>
module attributes {stable_mosaic.version = 11 : i64} {
  func.func @_ffn_resident_kernel(%arg0: i32, %arg1: memref<32x32xf32, #tpu.memory_space<vmem>>, %arg2: memref<32x128xf32, #tpu.memory_space<vmem>>, %arg3: memref<1x128xf32, #tpu.memory_space<vmem>>, %arg4: memref<128x32xf32, #tpu.memory_space<vmem>>, %arg5: memref<1x32xf32, #tpu.memory_space<vmem>>, %arg6: memref<32x32xf32, #tpu.memory_space<vmem>>) attributes {dimension_semantics = [#tpu.dimension_semantics<parallel>], iteration_bounds = array<i64: 1>, scalar_prefetch = 0 : i64, scratch_operands = 0 : i64, tpu.core_type = #tpu.core_type<tc>, window_params = [{transform_indices = @transform_0, window_bounds = array<i64: 32, 32>}, {pipeline_mode = #tpu.pipeline_mode<synchronous>, transform_indices = @transform_1, window_bounds = array<i64: 32, 128>}, {pipeline_mode = #tpu.pipeline_mode<synchronous>, transform_indices = @transform_2, window_bounds = array<i64: 1, 128>}, {pipeline_mode = #tpu.pipeline_mode<synchronous>, transform_indices = @transform_3, window_bounds = array<i64: 128, 32>}, {pipeline_mode = #tpu.pipeline_mode<synchronous>, transform_indices = @transform_4, window_bounds = array<i64: 1, 32>}, {transform_indices = @transform_5, window_bounds = array<i64: 32, 32>}]} {
    %c0 = arith.constant 0 : index
    %c0_0 = arith.constant 0 : index
    %0 = vector.load %arg1[%c0, %c0_0] : memref<32x32xf32, #tpu.memory_space<vmem>>, vector<32x32xf32>
    %c0_1 = arith.constant 0 : index
    %c0_2 = arith.constant 0 : index
    %1 = vector.load %arg2[%c0_1, %c0_2] : memref<32x128xf32, #tpu.memory_space<vmem>>, vector<32x128xf32>
    %cst = arith.constant dense<0.000000e+00> : vector<32x128xf32>
    %2 = tpu.matmul %0, %1, %cst {dimension_numbers = #tpu.dot_dimension_numbers<[1], [0], [0], [1], [0, 0, 1, 1], [], []>} : vector<32x32xf32>, vector<32x128xf32>, vector<32x128xf32> -> vector<32x128xf32>
    %c0_3 = arith.constant 0 : index
    %c0_4 = arith.constant 0 : index
    %3 = vector.load %arg3[%c0_3, %c0_4] : memref<1x128xf32, #tpu.memory_space<vmem>>, vector<1x128xf32>
    %4 = vector.broadcast %3 : vector<1x128xf32> to vector<32x128xf32>
    %5 = arith.addf %2, %4 : vector<32x128xf32>
    %cst_5 = arith.constant 5.000000e-01 : f32
    %6 = vector.broadcast %cst_5 : f32 to vector<32x128xf32>
    %7 = arith.mulf %6, %5 : vector<32x128xf32>
    %cst_6 = arith.constant 0.707106769 : f32
    %8 = vector.broadcast %cst_6 : f32 to vector<32x128xf32>
    %9 = arith.mulf %5, %8 : vector<32x128xf32>
    %10 = math.absf %9 : vector<32x128xf32>
    %cst_7 = arith.constant 0.327591091 : f32
    %11 = vector.broadcast %cst_7 : f32 to vector<32x128xf32>
    %12 = arith.mulf %11, %10 : vector<32x128xf32>
    %cst_8 = arith.constant 1.000000e+00 : f32
    %13 = vector.broadcast %cst_8 : f32 to vector<32x128xf32>
    %14 = arith.addf %13, %12 : vector<32x128xf32>
    %15 = tpu.reciprocal %14 {approx = true} : vector<32x128xf32> -> vector<32x128xf32>
    %16 = arith.mulf %14, %15 : vector<32x128xf32>
    %cst_9 = arith.constant 2.000000e+00 : f32
    %17 = vector.broadcast %cst_9 : f32 to vector<32x128xf32>
    %18 = arith.subf %17, %16 : vector<32x128xf32>
    %19 = arith.mulf %15, %18 : vector<32x128xf32>
    %cst_10 = arith.constant 1.06140542 : f32
    %20 = vector.broadcast %cst_10 : f32 to vector<32x128xf32>
    %21 = arith.mulf %20, %19 : vector<32x128xf32>
    %cst_11 = arith.constant -1.45315206 : f32
    %22 = vector.broadcast %cst_11 : f32 to vector<32x128xf32>
    %23 = arith.addf %21, %22 : vector<32x128xf32>
    %24 = arith.mulf %23, %19 : vector<32x128xf32>
    %cst_12 = arith.constant 1.42141378 : f32
    %25 = vector.broadcast %cst_12 : f32 to vector<32x128xf32>
    %26 = arith.addf %24, %25 : vector<32x128xf32>
    %27 = arith.mulf %26, %19 : vector<32x128xf32>
    %cst_13 = arith.constant -0.284496725 : f32
    %28 = vector.broadcast %cst_13 : f32 to vector<32x128xf32>
    %29 = arith.addf %27, %28 : vector<32x128xf32>
    %30 = arith.mulf %29, %19 : vector<32x128xf32>
    %cst_14 = arith.constant 0.254829586 : f32
    %31 = vector.broadcast %cst_14 : f32 to vector<32x128xf32>
    %32 = arith.addf %30, %31 : vector<32x128xf32>
    %33 = arith.mulf %32, %19 : vector<32x128xf32>
    %cst_15 = arith.constant 0.000000e+00 : f32
    %34 = vector.broadcast %cst_15 : f32 to vector<32x128xf32>
    %35 = arith.subf %34, %10 : vector<32x128xf32>
    %36 = arith.mulf %35, %10 : vector<32x128xf32>
    %37 = math.exp %36 : vector<32x128xf32>
    %38 = arith.mulf %33, %37 : vector<32x128xf32>
    %cst_16 = arith.constant 1.000000e+00 : f32
    %39 = vector.broadcast %cst_16 : f32 to vector<32x128xf32>
    %40 = arith.subf %39, %38 : vector<32x128xf32>
    %cst_17 = arith.constant 0.000000e+00 : f32
    %41 = vector.broadcast %cst_17 : f32 to vector<32x128xf32>
    %42 = arith.cmpf oge, %9, %41 : vector<32x128xf32>
    %cst_18 = arith.constant 0.000000e+00 : f32
    %43 = vector.broadcast %cst_18 : f32 to vector<32x128xf32>
    %44 = arith.subf %43, %40 : vector<32x128xf32>
    %45 = arith.select %42, %40, %44 : vector<32x128xi1>, vector<32x128xf32>
    %cst_19 = arith.constant 1.000000e+00 : f32
    %46 = vector.broadcast %cst_19 : f32 to vector<32x128xf32>
    %47 = arith.addf %46, %45 : vector<32x128xf32>
    %48 = arith.mulf %7, %47 : vector<32x128xf32>
    %c0_20 = arith.constant 0 : index
    %c0_21 = arith.constant 0 : index
    %49 = vector.load %arg4[%c0_20, %c0_21] : memref<128x32xf32, #tpu.memory_space<vmem>>, vector<128x32xf32>
    %cst_22 = arith.constant dense<0.000000e+00> : vector<32x32xf32>
    %50 = tpu.matmul %48, %49, %cst_22 {dimension_numbers = #tpu.dot_dimension_numbers<[1], [0], [0], [1], [0, 0, 1, 1], [], []>} : vector<32x128xf32>, vector<128x32xf32>, vector<32x32xf32> -> vector<32x32xf32>
    %c0_23 = arith.constant 0 : index
    %c0_24 = arith.constant 0 : index
    %51 = vector.load %arg5[%c0_23, %c0_24] : memref<1x32xf32, #tpu.memory_space<vmem>>, vector<1x32xf32>
    %52 = vector.broadcast %51 : vector<1x32xf32> to vector<32x32xf32>
    %53 = arith.addf %50, %52 : vector<32x32xf32>
    %c0_25 = arith.constant 0 : index
    %c0_26 = arith.constant 0 : index
    %54 = vector.load %arg6[%c0_25, %c0_26] : memref<32x32xf32, #tpu.memory_space<vmem>>, vector<32x32xf32>
    tpu.vector_store %arg6[%c0_25, %c0_26], %53 {strides = array<i32>} : memref<32x32xf32, #tpu.memory_space<vmem>>, vector<32x32xf32>,
    return
  }
  func.func @transform_0(%arg0: i32) -> (i32, i32) {
    %c0_i32 = arith.constant 0 : i32
    %c0_i32_0 = arith.constant 0 : i32
    return %arg0, %c0_i32 : i32, i32
  }
  func.func @transform_1(%arg0: i32) -> (i32, i32) {
    %c0_i32 = arith.constant 0 : i32
    %c0_i32_0 = arith.constant 0 : i32
    %c0_i32_1 = arith.constant 0 : i32
    return %c0_i32, %c0_i32_0 : i32, i32
  }
  func.func @transform_2(%arg0: i32) -> (i32, i32) {
    %c0_i32 = arith.constant 0 : i32
    %c0_i32_0 = arith.constant 0 : i32
    %c0_i32_1 = arith.constant 0 : i32
    return %c0_i32, %c0_i32_0 : i32, i32
  }
  func.func @transform_3(%arg0: i32) -> (i32, i32) {
    %c0_i32 = arith.constant 0 : i32
    %c0_i32_0 = arith.constant 0 : i32
    %c0_i32_1 = arith.constant 0 : i32
    return %c0_i32, %c0_i32_0 : i32, i32
  }
  func.func @transform_4(%arg0: i32) -> (i32, i32) {
    %c0_i32 = arith.constant 0 : i32
    %c0_i32_0 = arith.constant 0 : i32
    %c0_i32_1 = arith.constant 0 : i32
    return %c0_i32, %c0_i32_0 : i32, i32
  }
  func.func @transform_5(%arg0: i32) -> (i32, i32) {
    %c0_i32 = arith.constant 0 : i32
    %c0_i32_0 = arith.constant 0 : i32
    return %arg0, %c0_i32 : i32, i32
  }
}

</mosaic_0001>

<bundles_post_ra>
// kernel: tpu_custom_call.1
= control target key start
LH: loop header
LB: loop body
LE: loop exit
PB: predicated region body
PF: predicated region fallthrough
CT: control target
= control target key end

     0   :  { %10 = vsyncpa [#allocation3], 0  ;;  %vm36_vm0 = vcmask 261120   ;;  %s710_s0 = inlined_call_operand.vmem [shape: f32[16,32], index: 0, kind: input, shape index: {}]   ;;  %s711_s1 = inlined_call_operand.vmem [shape: f32[32,128], index: 1, kind: input, shape index: {}]   ;;  %s712_s2 = inlined_call_operand.vmem [shape: f32[1,128], index: 2, kind: input, shape index: {}]   ;;  %s713_s3 = inlined_call_operand.vmem [shape: f32[128,32], index: 3, kind: input, shape index: {}]   ;;  %s714_s4 = inlined_call_operand.vmem [shape: f32[1,32], index: 4, kind: input, shape index: {}]   ;;  %s715_s5 = inlined_call_operand.hbm [shape: f32[16,32], index: 5, kind: output, shape index: {}]  }
   0x1   :  { %v25_v0 = vld [vmem:[%s711_s1] sm:$0xff]  ;;  %v26_v1 = vld [vmem:[%s711_s1 + $0x8] sm:$0xff]  ;;  %v27_v3 = vld [vmem:[%s711_s1 + $0x10] sm:$0xff] }
   0x2   :  { %v464_v2 = vpack.c.bf16 %v26_v1, %v25_v0  ;;  %v28_v4 = vld [vmem:[%s711_s1 + $0x18] sm:$0xff]  ;;  %v21_v5 = vld [vmem:[%s710_s0] sm:$0xff]  ;;  %v22_v7 = vld [vmem:[%s710_s0 + $0x8] sm:$0xff] }
   0x3   :  { %v468_v6 = vpack.c.bf16 %v28_v4, %v27_v3  ;;  %420 = vmatprep.mubr.msk.f32.mxu0 %vm36_vm0, %v21_v5  ;;  %v23_v8 = vld [vmem:[%s710_s0 + $0x10] sm:$0xff]  ;;  %v24_v9 = vld [vmem:[%s710_s0 + $0x18] sm:$0xff]  ;;  %v250_v10 = vld [vmem:[%s713_s3] sm:$0xff] }
   0x4   :  { %465 = vmatprep.subr.bf16.mxu0 %v464_v2  ;;  %v251_v11 = vld [vmem:[%s713_s3 + $0x8] sm:$0xff]  ;;  %v252_v13 = vld [vmem:[%s713_s3 + $0x10] sm:$0xff]  ;;  %v253_v14 = vld [vmem:[%s713_s3 + $0x18] sm:$0xff] }
   0x5   :  { %467 = vmatpush3.bf16.msra.mxu0 %v464_v2  ;;  %v472_v12 = vpack.c.bf16 %v251_v11, %v250_v10  ;;  %v476_v15 = vpack.c.bf16 %v253_v14, %v252_v13  ;;  %v254_v16 = vld [vmem:[%s713_s3 + $0x20] sm:$0xff]  ;;  %v255_v17 = vld [vmem:[%s713_s3 + $0x28] sm:$0xff]  ;;  %v256_v18 = vld [vmem:[%s713_s3 + $0x30] sm:$0xff] }
   0x6   :  { %469 = vmatprep.subr.bf16.mxu0 %v468_v6  ;;  %v480_v19 = vpack.c.bf16 %v255_v17, %v254_v16  ;;  %v257_v20 = vld [vmem:[%s713_s3 + $0x38] sm:$0xff]  ;;  %v258_v22 = vld [vmem:[%s713_s3 + $0x40] sm:$0xff]  ;;  %v259_v23 = vld [vmem:[%s713_s3 + $0x48] sm:$0xff] }
   0x7   :  { %473 = vmatprep.subr.bf16.mxu1 %v472_v12  ;;  %v484_v21 = vpack.c.bf16 %v257_v20, %v256_v18  ;;  %v488_v24 = vpack.c.bf16 %v259_v23, %v258_v22  ;;  %v260_v25 = vld [vmem:[%s713_s3 + $0x50] sm:$0xff]  ;;  %v261_v26 = vld [vmem:[%s713_s3 + $0x58] sm:$0xff]  ;;  %v262_v28 = vld [vmem:[%s713_s3 + $0x60] sm:$0xff] }
   0x8   :  { %475 = vmatpush3.bf16.msra.mxu1 %v472_v12  ;;  %v492_v27 = vpack.c.bf16 %v261_v26, %v260_v25  ;;  %v263_v29 = vld [vmem:[%s713_s3 + $0x68] sm:$0xff]  ;;  %v264_v31 = vld [vmem:[%s713_s3 + $0x70] sm:$0xff]  ;;  %v265_v32 = vld [vmem:[%s713_s3 + $0x78] sm:$0xff] }
   0x9   :  { %471 = vmatpush3.bf16.msra.mxu0 %v468_v6  ;;  %477 = vmatprep.subr.bf16.mxu1 %v476_v15  ;;  %v496_v30 = vpack.c.bf16 %v263_v29, %v262_v28  ;;  %v500_v33 = vpack.c.bf16 %v265_v32, %v264_v31  ;;  %v378_v34 = vld [vmem:[%s712_s2] ss:$0 sm:$0xff] }
   0xc   :  { %421 = vmatmul.mubr.msk.f32.vlgmr.msra.gmra.mrb[0].mxu0 %vm36_vm0, %v22_v7  ;;  %479 = vmatpush3.bf16.msra.mxu1 %v476_v15 }
   0xd   :  { %423 = vmatprep.mubr.msk.f32.mxu0 %vm36_vm0, %v23_v8  ;;  %481 = vmatprep.subr.bf16.mxu1 %v480_v19 }
  0x10   :  { %424 = vmatmul.mubr.msk.f32.gmra.mrb[2].mxu0 %vm36_vm0, %v24_v9  ;;  %483 = vmatpush3.bf16.msra.mxu1 %v480_v19 }
  0x11   :  { %485 = vmatprep.subr.bf16.mxu1 %v484_v21 }
  0x14   :  { %487 = vmatpush3.bf16.msra.mxu1 %v484_v21 }
  0x15   :  { %489 = vmatprep.subr.bf16.mxu1 %v488_v24 }
  0x18   :  { %491 = vmatpush3.bf16.msra.mxu1 %v488_v24 }
  0x19   :  { %493 = vmatprep.subr.bf16.mxu1 %v492_v27 }
  0x1c   :  { %495 = vmatpush3.bf16.msra.mxu1 %v492_v27 }
  0x1d   :  { %497 = vmatprep.subr.bf16.mxu1 %v496_v30 }
  0x20   :  { %499 = vmatpush3.bf16.msra.mxu1 %v496_v30 }
  0x21   :  { %501 = vmatprep.subr.bf16.mxu1 %v500_v33 }
  0x24   :  { %503 = vmatpush3.bf16.msra.mxu1 %v500_v33 }
  0xdf   :  { %v422_v35 = vpop.f32.mrb[0].mxu0 }
  0xe0   :  { %v659_v36 = vadd.f32 %v422_v35, %v378_v34  ;;  %v115_v37 = vpop.f32.mrb[1].mxu0 }
  0xe1   :  { %v661_v38 = vadd.f32 %v378_v34, %v115_v37 }
  0xe2   :  { %v664_v39 = vmul.f32 0.70710677, %v659_v36 }
  0xe3   :  { %v667_v40 = vmul.f32 0.70710677, %v661_v38  ;;  %v425_v41 = vpop.f32.mrb[2].mxu0 }
  0xe4   :  { %v143_v42 = vand.u32 2147483647, %v664_v39  ;;  %v670_v43 = vadd.f32 %v425_v41, %v378_v34  ;;  %v125_v44 = vpop.f32.mrb[3].mxu0  ;;  %vm231_vm1 = vcmp.ge.f32.partialorder %v664_v39, 0.0 }
  0xe5   :  { %v142_v45 = vand.u32 2147483647, %v667_v40  ;;  %v673_v46 = vadd.f32 %v378_v34, %v125_v44  ;;  %vm230_vm2 = vcmp.ge.f32.partialorder %v667_v40, 0.0 }
  0xe6   :  { %v147_v47 = vmul.f32 0.3275911, %v143_v42  ;;  %v676_v48 = vmul.f32 0.70710677, %v670_v43  ;;  %v207_v62 = vsub.f32 0.0, %v143_v42 }
  0xe7   :  { %v146_v49 = vmul.f32 0.3275911, %v142_v45  ;;  %v679_v50 = vmul.f32 0.70710677, %v673_v46  ;;  %v206_v1 = vsub.f32 0.0, %v142_v45 }
  0xe8   :  { %v151_v51 = vadd.f32 1.0, %v147_v47  ;;  %v145_v52 = vand.u32 2147483647, %v676_v48  ;;  %v211_v7 = vmul.f32 %v207_v62, %v143_v42  ;;  %vm233_vm3 = vcmp.ge.f32.partialorder %v676_v48, 0.0 }
  0xe9   :  { %v150_v53 = vadd.f32 1.0, %v146_v49  ;;  %v144_v54 = vand.u32 2147483647, %v679_v50  ;;  %v210_v11 = vmul.f32 %v206_v1, %v142_v45  ;;  %vm232_vm4 = vcmp.ge.f32.partialorder %v679_v50, 0.0 }
  0xea   :  { %507 = vrcp.f32 %v151_v51  ;;  %v149_v55 = vmul.f32 0.3275911, %v145_v52  ;;  %v209_v9 = vsub.f32 0.0, %v145_v52  ;;  %v216_v19 = vmul.f32 1.442695, %v211_v7 }
  0xeb   :  { %509 = vrcp.f32 %v150_v53  ;;  %v148_v56 = vmul.f32 0.3275911, %v144_v54  ;;  %v208_v13 = vsub.f32 0.0, %v144_v54  ;;  %v214_v23 = vmul.f32 1.442695, %v210_v11 }
  0xec   :  { %v153_v57 = vadd.f32 1.0, %v149_v55  ;;  %v213_v20 = vmul.f32 %v209_v9, %v145_v52 }
  0xed   :  { %v152_v58 = vadd.f32 1.0, %v148_v56  ;;  %v212_v24 = vmul.f32 %v208_v13, %v144_v54 }
  0xee   :  { %511 = vrcp.f32 %v153_v57  ;;  %v220_v31 = vmul.f32 1.442695, %v213_v20 }
  0xef   :  { %513 = vrcp.f32 %v152_v58  ;;  %v218_v34 = vmul.f32 1.442695, %v212_v24 }
  0xf0   :  { %515 = vpow2.f32 %v216_v19 }
  0xf1   :  { %517 = vpow2.f32 %v214_v23 }
  0xf2   :  { %519 = vpow2.f32 %v220_v31 }
  0xf3   :  { %521 = vpow2.f32 %v218_v34 }
  0xf4   :  { %v508_v59 = vpop.eup %507 }
  0xf5   :  { %v510_v60 = vpop.eup %509  ;;  %v159_v61 = vmul.f32 %v508_v59, %v151_v51 }
  0xf6   :  { %v158_v63 = vmul.f32 %v510_v60, %v150_v53 }
  0xf7   :  { %v163_v0 = vsub.f32 2.0, %v159_v61 }
  0xf8   :  { %v512_v2 = vpop.eup %511  ;;  %v162_v3 = vsub.f32 2.0, %v158_v63 }
  0xf9   :  { %v514_v4 = vpop.eup %513  ;;  %v167_v5 = vmul.f32 %v508_v59, %v163_v0  ;;  %v161_v6 = vmul.f32 %v512_v2, %v153_v57 }
  0xfa   :  { %v166_v8 = vmul.f32 %v510_v60, %v162_v3  ;;  %v160_v10 = vmul.f32 %v514_v4, %v152_v58  ;;  %v516_v61 = vpop.eup %515 }
  0xfb   :  { %v165_v12 = vsub.f32 2.0, %v161_v6  ;;  %v171_v14 = vmul.f32 1.0614054, %v167_v5  ;;  %v518_v0 = vpop.eup %517 }
  0xfc   :  { %v164_v15 = vsub.f32 2.0, %v160_v10  ;;  %v170_v16 = vmul.f32 1.0614054, %v166_v8  ;;  %v520_v9 = vpop.eup %519 }
  0xfd   :  { %v169_v17 = vmul.f32 %v512_v2, %v165_v12  ;;  %v175_v18 = vadd.f32 -1.4531521, %v171_v14  ;;  %v522_v12 = vpop.eup %521 }
  0xfe   :  { %v168_v21 = vmul.f32 %v514_v4, %v164_v15  ;;  %v174_v22 = vadd.f32 -1.4531521, %v170_v16 }
  0xff   :  { %v179_v25 = vmul.f32 %v175_v18, %v167_v5  ;;  %v173_v26 = vmul.f32 1.0614054, %v169_v17 }
 0x100   :  { %v178_v27 = vmul.f32 %v174_v22, %v166_v8  ;;  %v172_v28 = vmul.f32 1.0614054, %v168_v21  ;;  %v134_v22 = vmul.f32 0.5, %v661_v38  ;;  %v137_v38 = vmul.f32 0.5, %v670_v43 }
 0x101   :  { %v183_v29 = vadd.f32 1.4214138, %v179_v25  ;;  %v177_v30 = vadd.f32 -1.4531521, %v173_v26 }
 0x102   :  { %v182_v32 = vadd.f32 1.4214138, %v178_v27  ;;  %v176_v33 = vadd.f32 -1.4531521, %v172_v28  ;;  %v136_v28 = vmul.f32 0.5, %v673_v46 }
 0x103   :  { %v187_v35 = vmul.f32 %v183_v29, %v167_v5  ;;  %v181_v37 = vmul.f32 %v177_v30, %v169_v17 }
 0x104   :  { %v186_v41 = vmul.f32 %v182_v32, %v166_v8  ;;  %v180_v42 = vmul.f32 %v176_v33, %v168_v21 }
 0x105   :  { %v191_v44 = vadd.f32 -0.28449672, %v187_v35  ;;  %v185_v45 = vadd.f32 1.4214138, %v181_v37 }
 0x106   :  { %v190_v47 = vadd.f32 -0.28449672, %v186_v41  ;;  %v184_v49 = vadd.f32 1.4214138, %v180_v42 }
 0x107   :  { %v195_v51 = vmul.f32 %v191_v44, %v167_v5  ;;  %v189_v52 = vmul.f32 %v185_v45, %v169_v17 }
 0x108   :  { %v194_v53 = vmul.f32 %v190_v47, %v166_v8  ;;  %v188_v54 = vmul.f32 %v184_v49, %v168_v21 }
 0x109   :  { %v199_v55 = vadd.f32 0.2548296, %v195_v51  ;;  %v193_v56 = vadd.f32 -0.28449672, %v189_v52 }
 0x10a   :  { %v198_v57 = vadd.f32 0.2548296, %v194_v53  ;;  %v192_v58 = vadd.f32 -0.28449672, %v188_v54 }
 0x10b   :  { %v203_v59 = vmul.f32 %v199_v55, %v167_v5  ;;  %v197_v60 = vmul.f32 %v193_v56, %v169_v17 }
 0x10c   :  { %v202_v62 = vmul.f32 %v198_v57, %v166_v8  ;;  %v196_v63 = vmul.f32 %v192_v58, %v168_v21 }
 0x10d   :  { %v223_v1 = vmul.f32 %v516_v61, %v203_v59  ;;  %v201_v2 = vadd.f32 0.2548296, %v197_v60 }
 0x10e   :  { %v222_v3 = vmul.f32 %v518_v0, %v202_v62  ;;  %v200_v4 = vadd.f32 0.2548296, %v196_v63 }
 0x10f   :  { %v227_v6 = vsub.f32 1.0, %v223_v1  ;;  %v205_v7 = vmul.f32 %v201_v2, %v169_v17 }
 0x110   :  { %v226_v10 = vsub.f32 1.0, %v222_v3  ;;  %v204_v11 = vmul.f32 %v200_v4, %v168_v21  ;;  %v135_v21 = vmul.f32 0.5, %v659_v36  ;;  %v383_v36 = vld [vmem:[%s714_s4] ss:$0 sm:$0xff] }
 0x111   :  { %v235_v13 = vsub.f32 0.0, %v227_v6  ;;  %v225_v14 = vmul.f32 %v520_v9, %v205_v7 }
 0x112   :  { %v234_v5 = vsub.f32 0.0, %v226_v10  ;;  %v224_v15 = vmul.f32 %v522_v12, %v204_v11 }
 0x113   :  { %v239_v8 = vsel %vm231_vm1, %v227_v6, %v235_v13  ;;  %v229_v16 = vsub.f32 1.0, %v225_v14 }
 0x114   :  { %v238_v18 = vsel %vm230_vm2, %v226_v10, %v234_v5  ;;  %v243_v19 = vadd.f32 1.0, %v239_v8  ;;  %v228_v20 = vsub.f32 1.0, %v224_v15 }
 0x115   :  { %v242_v17 = vadd.f32 1.0, %v238_v18  ;;  %v237_v23 = vsub.f32 0.0, %v229_v16 }
 0x116   :  { %v236_v24 = vsub.f32 0.0, %v228_v20  ;;  %v247_v26 = vmul.f32 %v243_v19, %v135_v21 }
 0x117   :  { %v246_v39 = vmul.f32 %v242_v17, %v134_v22  ;;  %v241_v25 = vsel %vm233_vm3, %v229_v16, %v237_v23 }
 0x118   :  { %v240_v40 = vsel %vm232_vm4, %v228_v20, %v236_v24  ;;  %v245_v27 = vadd.f32 1.0, %v241_v25 }
 0x119   :  { %458 = vmatprep.mubr.f32.mxu1 %v246_v39  ;;  %v244_v29 = vadd.f32 1.0, %v240_v40 }
 0x11a   :  { %459 = vmatmul.mubr.f32.vlgmr.msra.gmra.mrb[0].mxu1 %v247_v26  ;;  %v249_v31 = vmul.f32 %v245_v27, %v137_v38 }
 0x11b   :  { %v248_v30 = vmul.f32 %v244_v29, %v136_v28 }
 0x11d   :  { %461 = vmatprep.mubr.f32.mxu1 %v248_v30 }
 0x11e   :  { %462 = vmatmul.mubr.f32.gmra.mrb[2].mxu1 %v249_v31 }
 0x1ed   :  { %v460_v48 = vpop.f32.mrb[0].mxu1 }
 0x1ee   :  { %v345_v50 = vadd.f32 %v460_v48, %v383_v36  ;;  %v339_v32 = vpop.f32.mrb[1].mxu1 }
 0x1ef   :  { %v340_v33 = vadd.f32 %v383_v36, %v339_v32 }
 0x1f0   :  { %359 = vst.msk [vmem:[#allocation2 + $0x8] sm:$0xff] %vm36_vm0, %v345_v50 }
 0x1f1   :  { %358 = vst.msk [vmem:[#allocation2] sm:$0xff] %vm36_vm0, %v340_v33  ;;  %v463_v46 = vpop.f32.mrb[2].mxu1 }
 0x1f2   :  { %v355_v34 = vadd.f32 %v463_v46, %v383_v36  ;;  %v349_v43 = vpop.f32.mrb[3].mxu1 }
 0x1f3   :  { %v350_v35 = vadd.f32 %v383_v36, %v349_v43 }
 0x1f4   :  { %361 = vst.msk [vmem:[#allocation2 + $0x18] sm:$0xff] %vm36_vm0, %v355_v34 }
 0x1f5   :  { %360 = vst.msk [vmem:[#allocation2 + $0x10] sm:$0xff] %vm36_vm0, %v350_v35 }
 0x1f6   :  { %366 = vsyncadd [#allocation3], 256  ;;  %s547_s15 = smov [#allocation2]  }
 0x1f7   :  { %s367_s0 = sshll.u32 %s547_s15, 4  ;;  %s368_s0 = int_to_ptr.vmem [resolvable:$true] %s367_s0 }
 0x1f8   :  { %s523_s4 = scalar_lea.vmem %s368_s0, 256  ;;  %s527_s16 = scalar_lea.vmem %s368_s0, 512 }
 0x1f9   :  { %p524_p0 = scmp.ne.s32.totalorder %s368_s0, %s523_s4  ;;  %p528_p1 = scmp.lt.s32.totalorder %s368_s0, %s368_s0 }
 0x1fa   :  { %p529_p2 = scmp.lt.s32.totalorder %s527_s16, %s523_s4 }
 0x1fc   :  { %p530_p3 = por %p529_p2, %p528_p1 }
 0x1fe   :  { %p531_p4 = pnand %p530_p3, %p524_p0 }
 0x200   :  { %534 = shalt.err (!%p531_p4)
}
 0x201   :  { %s535_s19 = scalar_lea.hbm %s715_s5, 256 }
 0x202   :  { %p536_p5 = scmp.ne.s32.totalorder %s715_s5, %s535_s19  ;;  %p539_p6 = scmp.lt.u32.totalorder %s535_s19, %s715_s5 }
 0x204   :  { %p541_p7 = pnand %p539_p6, %p536_p5 }
 0x206   :  { %544 = shalt.err (!%p541_p7)
}
 0x207   :  { %s548_s24 = smov 128   ;;  %s549_s25 = smov 8  }
 0x208   :  { %373 = dma.vmem_to_hbm [thread:$0]  %s368_s0, 256, %s715_s5, [#allocation3], %s548_s24, %s548_s24, %s549_s25  }
 0x209   :  { %545 = dma.done.wait [#allocation3], 512  }
 0x20a   :  { %546 = vsyncadd [#allocation3], 4294966784 }
 0x20b   :  { %377 = vsyncpa [#allocation3], 1 }

</bundles_post_ra>
